<compile_context>
chip_gen: v7x
topology: tpu7x:2x2x1
jax: 0.10.0
libtpu: 0.0.40
codegen_flags: <defaults>
</compile_context>

<pallas_src>
import functools

import jax
import jax.numpy as jnp
from jax.experimental import pallas as pl
from jax.experimental.pallas import tpu as pltpu


# ----------------------------- Pallas kernel ------------------------------- #

def _wce_kernel(w_sref, *refs, num_preds, has_invalid, num_classes,
                ignore_index, s_total, ts, gs_inner):
    """Weighted cross-entropy partial sums for one (C, TS) channels-first tile.

    w_sref:  (C,) f32 class weights, scalar-prefetched into SMEM.
    refs layout:
      labels (1,1,TS) int, [invalid (1,1,TS) int], preds x P (1,C,TS),
      nll_out (1,1,1,1) f32, wsum_out (1,1,1,1) f32  (resident accumulators).
    """
    idx = 0
    labels_ref = refs[idx]; idx += 1
    if has_invalid:
        invalid_ref = refs[idx]; idx += 1
    pred_refs = refs[idx:idx + num_preds]; idx += num_preds
    nll_ref = refs[idx]
    wsum_ref = refs[idx + 1]

    sb = pl.program_id(1)
    s = pl.program_id(2)

    # Zero the resident accumulators at the start of the reduction axis.
    @pl.when(s == 0)
    def _():
        nll_ref[...] = jnp.zeros_like(nll_ref)
        wsum_ref[...] = jnp.zeros_like(wsum_ref)

    y = labels_ref[0].astype(jnp.int32)                              # (1, TS)

    # valid = (label != ignore_index) AND lane within real S AND not invalid.
    s_blk = sb * gs_inner + s
    pos = s_blk * ts + jax.lax.broadcasted_iota(jnp.int32, (1, ts), 1)
    valid = jnp.logical_and(y != ignore_index, pos < s_total)        # (1, TS)
    if has_invalid:
        valid = jnp.logical_and(valid, invalid_ref[0] == 0)

    # Per-position class weight: pure-VALU select chain over SMEM scalars
    # (no one-hot materialization, no XLU sublane reduce).
    w_y = jnp.zeros((1, ts), dtype=jnp.float32)
    for ci in range(num_classes):
        w_y = jnp.where(y == ci, w_sref[ci], w_y)
    w_valid = jnp.where(valid, w_y, 0.0)                             # (1, TS)

    # bool class selector, shared by all prediction heads (no f32 onehot).
    cls = jax.lax.broadcasted_iota(jnp.int32, (num_classes, ts), 0)  # (C, TS)
    sel = (cls == y)                                                 # (C, TS)

    contrib = jnp.zeros((1, ts), dtype=jnp.float32)
    for p_ref in pred_refs:                                          # unrolled
        x = p_ref[0].astype(jnp.float32)                             # (C, TS)
        m = jnp.max(x, axis=0, keepdims=True)                        # (1, TS)
        lse = jnp.log(jnp.sum(jnp.exp(x - m), axis=0, keepdims=True))
        x_y = jnp.sum(jnp.where(sel, x, 0.0), axis=0, keepdims=True)
        nll = m + lse - x_y                                          # -log_softmax[y]
        # keep the where(): masks NaN/garbage from the ragged tail.
        contrib = contrib + jnp.where(valid, w_y * nll, 0.0)

    nll_ref[...] += jnp.sum(contrib, axis=1, keepdims=True).reshape(1, 1, 1, 1)
    wsum_ref[...] += jnp.sum(w_valid, axis=1, keepdims=True).reshape(1, 1, 1, 1)


# ------------------------------ tile choice --------------------------------- #

def _choose_tile(s_total, c, num_preds, itemsize, has_invalid,
                 vmem_budget_bytes=8 * 1024 * 1024, max_ts=4096):
    """Largest lane tile whose double-buffered working set fits the budget.

    Accounts for sublane padding (f32->8, bf16->16, int8->32), the padded
    (1,TS) label / invalid tiles, and ~4 (C,TS) f32 in-kernel temporaries.
    """
    sub = 8 * (4 // itemsize) if itemsize in (1, 2, 4) else 8
    c_pad = -(-c // sub) * sub
    c_pad32 = -(-c // 8) * 8
    per_lane = 2 * num_preds * c_pad * itemsize      # double-buffered logits tiles
    per_lane += 2 * 8 * 4                            # labels (1,TS) padded to 8 sublanes
    if has_invalid:
        per_lane += 2 * 8 * 4                        # invalid-voxel mask tile
    per_lane += 4 * c_pad32 * 4                      # in-kernel f32 temporaries
    ts = max(vmem_budget_bytes // per_lane, 128)
    ts = min(ts, max_ts)
    if ts >= s_total:
        return s_total                               # full dim is always allowed
    return max(128, (ts // 128) * 128)               # keep lane alignment


# ------------------------------ wrapper -------------------------------------- #

def weighted_ce_sums(preds, labels, weight, *, ignore_index, invalid=None):
    """Partial sums for PyTorch-style weighted cross-entropy.

    preds:   list of (N, C, S) channels-first logits (any float dtype).
    labels:  (N, S) integer labels.
    weight:  (C,) class weights.
    invalid: optional (N, S) mask; positions with invalid != 0 are ignored
             (fused equivalent of `gt[invalid == 1] = ignore_index`).
    Returns (sum over preds/positions of w[y]*nll, sum over positions of w[y]).
    """
    N, C, S = preds[0].shape
    P = len(preds)
    # Fused single-denominator trick is only valid with shared labels/shapes.
    assert all(p.shape == (N, C, S) for p in preds), \
        "all fused prediction heads must share (N, C, S) and the same labels"

    itemsize = jnp.dtype(preds[0].dtype).itemsize
    has_invalid = invalid is not None
    ts = _choose_tile(S, C, P, itemsize, has_invalid)
    gs_total = pl.cdiv(S, ts)
    sb = 2 if gs_total >= 2 else 1            # small parallel super-block (v7x 2 TCs)
    gs_inner = pl.cdiv(gs_total, sb)

    labels3 = labels.reshape(N, 1, S)
    w = jnp.asarray(weight, jnp.float32).reshape(C)

    def tile_map(n, b, s, _w, g=gs_inner):
        return (n, 0, b * g + s)

    inputs = [labels3]
    in_specs = [pl.BlockSpec((1, 1, ts), tile_map)]
    if has_invalid:
        inputs.append(invalid.reshape(N, 1, S))
        in_specs.append(pl.BlockSpec((1, 1, ts), tile_map))
    inputs += list(preds)
    in_specs += [pl.BlockSpec((1, C, ts), tile_map) for _ in range(P)]

    out_map = lambda n, b, s, _w: (n, b, 0, 0)          # resident across s

    kernel = functools.partial(
        _wce_kernel, num_preds=P, has_invalid=has_invalid, num_classes=C,
        ignore_index=int(ignore_index), s_total=S, ts=ts, gs_inner=gs_inner)

    bytes_accessed = P * N * C * S * itemsize + N * S * labels3.dtype.itemsize
    if has_invalid:
        bytes_accessed += N * S * inputs[1].dtype.itemsize
    cost = pl.CostEstimate(flops=int(6 * P * N * C * S),
                           transcendentals=int(P * N * (C + 1) * S),
                           bytes_accessed=int(bytes_accessed))

    nll_parts, w_parts = pl.pallas_call(
        kernel,
        out_shape=(jax.ShapeDtypeStruct((N, sb, 1, 1), jnp.float32),
                   jax.ShapeDtypeStruct((N, sb, 1, 1), jnp.float32)),
        grid_spec=pltpu.PrefetchScalarGridSpec(
            num_scalar_prefetch=1,
            grid=(N, sb, gs_inner),
            in_specs=in_specs,
            out_specs=(pl.BlockSpec((1, 1, 1, 1), out_map),
                       pl.BlockSpec((1, 1, 1, 1), out_map))),
        compiler_params=pltpu.CompilerParams(
            dimension_semantics=("parallel", "parallel", "arbitrary"),
            vmem_limit_bytes=32 * 1024 * 1024),
        cost_estimate=cost,
    )(w, *inputs)

    return jnp.sum(nll_parts), jnp.sum(w_parts)


# ------------------------------ Loss forward -------------------------------- #

def loss_forward(seg_pred, seg_gt, seg_w, complt_pred, complt_gt, complt_w,
                 invalid_voxels, sigma, args):
    """Mirrors Loss.forward. Returns (loss, loss_seg, loss_complet)."""
    # ---- segmentation loss (weighted mean CE) ----
    N, Cs = seg_pred.shape[:2]
    seg_logits = seg_pred.reshape(N, Cs, -1)          # free reshape, no copy
    seg_labels = seg_gt.reshape(N, -1)
    nll_s, ws_s = weighted_ce_sums([seg_logits], seg_labels, seg_w,
                                   ignore_index=-100)
    loss_seg = nll_s / ws_s

    # ---- completion loss: invalid-voxel masking fused into the kernel ----
    Cc = complt_pred[0].shape[1]
    preds = [p.reshape(N, Cc, -1) for p in complt_pred]   # fused single call
    labels = complt_gt.reshape(N, -1)
    invalid = invalid_voxels.reshape(N, -1)
    nll_c, ws_c = weighted_ce_sums(preds, labels, complt_w,
                                   ignore_index=255, invalid=invalid)
    # PyTorch reference sums per-head CE then divides by the number of heads.
    loss_complet = (nll_c / ws_c) / len(complt_pred)

    # ---- combination ----
    if args['TRAIN']['uncertainty_loss']:
        factor_seg = 1.0 / sigma[0] ** 2
        factor_complt = 1.0 / sigma[1] ** 2
        loss = (factor_seg * loss_seg + factor_complt * loss_complet
                + 2.0 * jnp.log(sigma[0]) + 2.0 * jnp.log(sigma[1]))
    else:
        lw = args['TRAIN']['loss_weight']
        loss = lw[0] * loss_seg + lw[1] * loss_complet
    return loss, loss_seg, loss_complet


# ------------------------- pure-JAX reference (check) ----------------------- #

def _ref_ce(logits_ncs, labels_ns, weight, ignore_index):
    C = logits_ncs.shape[1]
    x = jnp.moveaxis(logits_ncs, 1, -1).reshape(-1, C).astype(jnp.float32)
    y = labels_ns.reshape(-1).astype(jnp.int32)
    logp = jax.nn.log_softmax(x, axis=-1)
    valid = (y != ignore_index)
    ysafe = jnp.where(valid, y, 0)
    nll = -jnp.take_along_axis(logp, ysafe[:, None], axis=-1)[:, 0]
    w = jnp.asarray(weight, jnp.float32)[ysafe] * valid.astype(jnp.float32)
    return jnp.sum(w * nll) / jnp.sum(w)


# ---------------------------------- main ------------------------------------ #

if __name__ == "__main__":
    args = {'TRAIN': {'uncertainty_loss': True, 'loss_weight': [1.0, 1.0]}}

    key = jax.random.PRNGKey(0)
    k = jax.random.split(key, 8)

    N, Cs, H, W = 2, 4, 16, 16        # segmentation: (N, Cs, H, W) channels-first
    Cc, D = 4, 8                      # completion:   (N, Cc, D, D, D)

    seg_pred = jax.random.normal(k[0], (N, Cs, H, W), dtype=jnp.float32)
    seg_gt = jax.random.randint(k[1], (N, H, W), 0, Cs, dtype=jnp.int32)
    seg_w = jax.random.uniform(k[2], (Cs,), minval=0.5, maxval=1.5,
                               dtype=jnp.float32)

    complt_pred = [
        jax.random.normal(k[3], (N, Cc, D, D, D), dtype=jnp.float32),
        jax.random.normal(k[4], (N, Cc, D, D, D), dtype=jnp.float32),
    ]
    complt_gt = jax.random.randint(k[5], (N, D, D, D), 0, Cc, dtype=jnp.int32)
    complt_w = jax.random.uniform(k[6], (Cc,), minval=0.5, maxval=1.5,
                                  dtype=jnp.float32)
    invalid_voxels = jax.random.bernoulli(k[7], 0.2, (N, D, D, D)).astype(jnp.int32)
    sigma = jnp.array([1.2, 0.8], dtype=jnp.float32)

    loss, loss_seg, loss_complet = loss_forward(
        seg_pred, seg_gt, seg_w, complt_pred, complt_gt, complt_w,
        invalid_voxels, sigma, args)
    jax.block_until_ready((loss, loss_seg, loss_complet))

    # sanity check against a pure-JAX reference of the same PyTorch semantics
    ref_seg = _ref_ce(seg_pred.reshape(N, Cs, -1), seg_gt.reshape(N, -1),
                      seg_w, -100)
    gt_ref = jnp.where(invalid_voxels == 1, 255, complt_gt.astype(jnp.int32))
    ref_complt = sum(_ref_ce(p.reshape(N, Cc, -1), gt_ref.reshape(N, -1),
                             complt_w, 255) for p in complt_pred)
    ref_complt = ref_complt / len(complt_pred)
    assert jnp.allclose(loss_seg, ref_seg, rtol=1e-3, atol=1e-3), (loss_seg, ref_seg)
    assert jnp.allclose(loss_complet, ref_complt, rtol=1e-3, atol=1e-3), (
        loss_complet, ref_complt)

    print("KERNEL_OK")
</pallas_src>

<mosaic_0001>
module attributes {stable_mosaic.version = 11 : i64} {
  func.func @_wce_kernel(%arg0: i32, %arg1: i32, %arg2: i32, %arg3: memref<4xf32, #tpu.memory_space<smem>>, %arg4: memref<1x1x256xi32, #tpu.memory_space<vmem>>, %arg5: memref<1x4x256xf32, #tpu.memory_space<vmem>>, %arg6: memref<1x1x1x1xf32, #tpu.memory_space<vmem>>, %arg7: memref<1x1x1x1xf32, #tpu.memory_space<vmem>>) attributes {dimension_semantics = [#tpu.dimension_semantics<parallel>, #tpu.dimension_semantics<parallel>, #tpu.dimension_semantics<arbitrary>], iteration_bounds = array<i64: 2, 1, 1>, scalar_prefetch = 1 : i64, scratch_operands = 0 : i64, tpu.core_type = #tpu.core_type<tc>, window_params = [{transform_indices = @transform_0, window_bounds = array<i64: 1, 1, 256>}, {transform_indices = @transform_1, window_bounds = array<i64: 1, 4, 256>}, {transform_indices = @transform_2, window_bounds = array<i64: 1, 1, 1, 1>}, {transform_indices = @transform_3, window_bounds = array<i64: 1, 1, 1, 1>}]} {
    %c0_i32 = arith.constant 0 : i32
    %0 = arith.cmpi eq, %arg2, %c0_i32 : i32
    %1 = arith.extui %0 : i1 to i32
    %c0_i32_0 = arith.constant 0 : i32
    %2 = arith.cmpi ne, %1, %c0_i32_0 : i32
    scf.if %2 {
      %cst_35 = arith.constant 0.000000e+00 : f32
      %75 = vector.broadcast %cst_35 : f32 to vector<1x1x1x1xf32>
      %c0_36 = arith.constant 0 : index
      %c0_37 = arith.constant 0 : index
      %c0_38 = arith.constant 0 : index
      %c0_39 = arith.constant 0 : index
      %76 = vector.load %arg6[%c0_36, %c0_37, %c0_38, %c0_39] : memref<1x1x1x1xf32, #tpu.memory_space<vmem>>, vector<1x1x1x1xf32>
      tpu.vector_store %arg6[%c0_36, %c0_37, %c0_38, %c0_39], %75 {strides = array<i32>} : memref<1x1x1x1xf32, #tpu.memory_space<vmem>>, vector<1x1x1x1xf32>,
      %cst_40 = arith.constant 0.000000e+00 : f32
      %77 = vector.broadcast %cst_40 : f32 to vector<1x1x1x1xf32>
      %c0_41 = arith.constant 0 : index
      %c0_42 = arith.constant 0 : index
      %c0_43 = arith.constant 0 : index
      %c0_44 = arith.constant 0 : index
      %78 = vector.load %arg7[%c0_41, %c0_42, %c0_43, %c0_44] : memref<1x1x1x1xf32, #tpu.memory_space<vmem>>, vector<1x1x1x1xf32>
      tpu.vector_store %arg7[%c0_41, %c0_42, %c0_43, %c0_44], %77 {strides = array<i32>} : memref<1x1x1x1xf32, #tpu.memory_space<vmem>>, vector<1x1x1x1xf32>,
    } else {
    }
    %c0 = arith.constant 0 : index
    %c0_1 = arith.constant 0 : index
    %c0_2 = arith.constant 0 : index
    %3 = vector.load %arg4[%c0, %c0_1, %c0_2] : memref<1x1x256xi32, #tpu.memory_space<vmem>>, vector<1x1x256xi32>
    %4 = vector.shape_cast %3 : vector<1x1x256xi32> to vector<1x256xi32>
    %c1_i32 = arith.constant 1 : i32
    %5 = arith.muli %arg1, %c1_i32 : i32
    %6 = arith.addi %5, %arg2 : i32
    %c256_i32 = arith.constant 256 : i32
    %7 = arith.muli %6, %c256_i32 : i32
    %8 = tpu.iota {dimensions = array<i32: 1>} : vector<1x256xi32>
    %9 = vector.broadcast %7 : i32 to vector<1x256xi32>
    %10 = arith.addi %9, %8 : vector<1x256xi32>
    %c-100_i32 = arith.constant -100 : i32
    %11 = vector.broadcast %c-100_i32 : i32 to vector<1x256xi32>
    %12 = arith.cmpi ne, %4, %11 : vector<1x256xi32>
    %c256_i32_3 = arith.constant 256 : i32
    %13 = vector.broadcast %c256_i32_3 : i32 to vector<1x256xi32>
    %14 = arith.cmpi slt, %10, %13 : vector<1x256xi32>
    %15 = arith.andi %12, %14 : vector<1x256xi1>
    %cst = arith.constant 0.000000e+00 : f32
    %16 = vector.broadcast %cst : f32 to vector<1x256xf32>
    %c0_i32_4 = arith.constant 0 : i32
    %17 = vector.broadcast %c0_i32_4 : i32 to vector<1x256xi32>
    %18 = arith.cmpi eq, %4, %17 : vector<1x256xi32>
    %c0_5 = arith.constant 0 : index
    %19 = memref.load %arg3[%c0_5] : memref<4xf32, #tpu.memory_space<smem>>
    %20 = vector.broadcast %19 : f32 to vector<1x256xf32>
    %21 = arith.select %18, %20, %16 : vector<1x256xi1>, vector<1x256xf32>
    %c1_i32_6 = arith.constant 1 : i32
    %22 = vector.broadcast %c1_i32_6 : i32 to vector<1x256xi32>
    %23 = arith.cmpi eq, %4, %22 : vector<1x256xi32>
    %c1 = arith.constant 1 : index
    %24 = memref.load %arg3[%c1] : memref<4xf32, #tpu.memory_space<smem>>
    %25 = vector.broadcast %24 : f32 to vector<1x256xf32>
    %26 = arith.select %23, %25, %21 : vector<1x256xi1>, vector<1x256xf32>
    %c2_i32 = arith.constant 2 : i32
    %27 = vector.broadcast %c2_i32 : i32 to vector<1x256xi32>
    %28 = arith.cmpi eq, %4, %27 : vector<1x256xi32>
    %c2 = arith.constant 2 : index
    %29 = memref.load %arg3[%c2] : memref<4xf32, #tpu.memory_space<smem>>
    %30 = vector.broadcast %29 : f32 to vector<1x256xf32>
    %31 = arith.select %28, %30, %26 : vector<1x256xi1>, vector<1x256xf32>
    %c3_i32 = arith.constant 3 : i32
    %32 = vector.broadcast %c3_i32 : i32 to vector<1x256xi32>
    %33 = arith.cmpi eq, %4, %32 : vector<1x256xi32>
    %c3 = arith.constant 3 : index
    %34 = memref.load %arg3[%c3] : memref<4xf32, #tpu.memory_space<smem>>
    %35 = vector.broadcast %34 : f32 to vector<1x256xf32>
    %36 = arith.select %33, %35, %31 : vector<1x256xi1>, vector<1x256xf32>
    %cst_7 = arith.constant 0.000000e+00 : f32
    %37 = vector.broadcast %cst_7 : f32 to vector<1x256xf32>
    %38 = arith.select %15, %36, %37 : vector<1x256xi1>, vector<1x256xf32>
    %39 = tpu.iota {dimensions = array<i32: 0>} : vector<4x256xi32>
    %40 = vector.broadcast %4 : vector<1x256xi32> to vector<4x256xi32>
    %41 = arith.cmpi eq, %39, %40 : vector<4x256xi32>
    %cst_8 = arith.constant 0.000000e+00 : f32
    %42 = vector.broadcast %cst_8 : f32 to vector<1x256xf32>
    %c0_9 = arith.constant 0 : index
    %c0_10 = arith.constant 0 : index
    %c0_11 = arith.constant 0 : index
    %43 = vector.load %arg5[%c0_9, %c0_10, %c0_11] : memref<1x4x256xf32, #tpu.memory_space<vmem>>, vector<1x4x256xf32>
    %44 = vector.shape_cast %43 : vector<1x4x256xf32> to vector<4x256xf32>
    %cst_12 = arith.constant dense<0xFF800000> : vector<256xf32>
    %45 = vector.multi_reduction <maximumf>, %44, %cst_12 [0] : vector<4x256xf32> to vector<256xf32>
    %46 = vector.shape_cast %45 : vector<256xf32> to vector<1x256xf32>
    %47 = vector.broadcast %46 : vector<1x256xf32> to vector<4x256xf32>
    %48 = arith.subf %44, %47 : vector<4x256xf32>
    %49 = math.exp %48 : vector<4x256xf32>
    %cst_13 = arith.constant dense<0.000000e+00> : vector<256xf32>
    %50 = vector.multi_reduction <add>, %49, %cst_13 [0] : vector<4x256xf32> to vector<256xf32>
    %51 = vector.shape_cast %50 : vector<256xf32> to vector<1x256xf32>
    %52 = math.log %51 : vector<1x256xf32>
    %cst_14 = arith.constant 0.000000e+00 : f32
    %53 = vector.broadcast %cst_14 : f32 to vector<4x256xf32>
    %54 = arith.select %41, %44, %53 : vector<4x256xi1>, vector<4x256xf32>
    %cst_15 = arith.constant dense<0.000000e+00> : vector<256xf32>
    %55 = vector.multi_reduction <add>, %54, %cst_15 [0] : vector<4x256xf32> to vector<256xf32>
    %56 = vector.shape_cast %55 : vector<256xf32> to vector<1x256xf32>
    %57 = arith.addf %46, %52 : vector<1x256xf32>
    %58 = arith.subf %57, %56 : vector<1x256xf32>
    %59 = arith.mulf %36, %58 : vector<1x256xf32>
    %cst_16 = arith.constant 0.000000e+00 : f32
    %60 = vector.broadcast %cst_16 : f32 to vector<1x256xf32>
    %61 = arith.select %15, %59, %60 : vector<1x256xi1>, vector<1x256xf32>
    %62 = arith.addf %42, %61 : vector<1x256xf32>
    %c0_17 = arith.constant 0 : index
    %c0_18 = arith.constant 0 : index
    %c0_19 = arith.constant 0 : index
    %c0_20 = arith.constant 0 : index
    %63 = vector.load %arg6[%c0_17, %c0_18, %c0_19, %c0_20] : memref<1x1x1x1xf32, #tpu.memory_space<vmem>>, vector<1x1x1x1xf32>
    %cst_21 = arith.constant dense<0.000000e+00> : vector<1xf32>
    %64 = vector.multi_reduction <add>, %62, %cst_21 [1] : vector<1x256xf32> to vector<1xf32>
    %65 = vector.shape_cast %64 : vector<1xf32> to vector<1x1xf32>
    %66 = vector.shape_cast %65 : vector<1x1xf32> to vector<1x1x1x1xf32>
    %67 = arith.addf %63, %66 : vector<1x1x1x1xf32>
    %c0_22 = arith.constant 0 : index
    %c0_23 = arith.constant 0 : index
    %c0_24 = arith.constant 0 : index
    %c0_25 = arith.constant 0 : index
    %68 = vector.load %arg6[%c0_22, %c0_23, %c0_24, %c0_25] : memref<1x1x1x1xf32, #tpu.memory_space<vmem>>, vector<1x1x1x1xf32>
    tpu.vector_store %arg6[%c0_22, %c0_23, %c0_24, %c0_25], %67 {strides = array<i32>} : memref<1x1x1x1xf32, #tpu.memory_space<vmem>>, vector<1x1x1x1xf32>,
    %c0_26 = arith.constant 0 : index
    %c0_27 = arith.constant 0 : index
    %c0_28 = arith.constant 0 : index
    %c0_29 = arith.constant 0 : index
    %69 = vector.load %arg7[%c0_26, %c0_27, %c0_28, %c0_29] : memref<1x1x1x1xf32, #tpu.memory_space<vmem>>, vector<1x1x1x1xf32>
    %cst_30 = arith.constant dense<0.000000e+00> : vector<1xf32>
    %70 = vector.multi_reduction <add>, %38, %cst_30 [1] : vector<1x256xf32> to vector<1xf32>
    %71 = vector.shape_cast %70 : vector<1xf32> to vector<1x1xf32>
    %72 = vector.shape_cast %71 : vector<1x1xf32> to vector<1x1x1x1xf32>
    %73 = arith.addf %69, %72 : vector<1x1x1x1xf32>
    %c0_31 = arith.constant 0 : index
    %c0_32 = arith.constant 0 : index
    %c0_33 = arith.constant 0 : index
    %c0_34 = arith.constant 0 : index
    %74 = vector.load %arg7[%c0_31, %c0_32, %c0_33, %c0_34] : memref<1x1x1x1xf32, #tpu.memory_space<vmem>>, vector<1x1x1x1xf32>
    tpu.vector_store %arg7[%c0_31, %c0_32, %c0_33, %c0_34], %73 {strides = array<i32>} : memref<1x1x1x1xf32, #tpu.memory_space<vmem>>, vector<1x1x1x1xf32>,
    return
  }
  func.func @transform_0(%arg0: i32, %arg1: i32, %arg2: i32, %arg3: memref<4xf32, #tpu.memory_space<smem>>) -> (i32, i32, i32) {
    %c1_i32 = arith.constant 1 : i32
    %0 = arith.muli %arg1, %c1_i32 : i32
    %1 = arith.addi %0, %arg2 : i32
    %c0_i32 = arith.constant 0 : i32
    %c0_i32_0 = arith.constant 0 : i32
    return %arg0, %c0_i32, %1 : i32, i32, i32
  }
  func.func @transform_1(%arg0: i32, %arg1: i32, %arg2: i32, %arg3: memref<4xf32, #tpu.memory_space<smem>>) -> (i32, i32, i32) {
    %c1_i32 = arith.constant 1 : i32
    %0 = arith.muli %arg1, %c1_i32 : i32
    %1 = arith.addi %0, %arg2 : i32
    %c0_i32 = arith.constant 0 : i32
    %c0_i32_0 = arith.constant 0 : i32
    return %arg0, %c0_i32, %1 : i32, i32, i32
  }
  func.func @transform_2(%arg0: i32, %arg1: i32, %arg2: i32, %arg3: memref<4xf32, #tpu.memory_space<smem>>) -> (i32, i32, i32, i32) {
    %c0_i32 = arith.constant 0 : i32
    %c0_i32_0 = arith.constant 0 : i32
    %c0_i32_1 = arith.constant 0 : i32
    return %arg0, %arg1, %c0_i32, %c0_i32_0 : i32, i32, i32, i32
  }
  func.func @transform_3(%arg0: i32, %arg1: i32, %arg2: i32, %arg3: memref<4xf32, #tpu.memory_space<smem>>) -> (i32, i32, i32, i32) {
    %c0_i32 = arith.constant 0 : i32
    %c0_i32_0 = arith.constant 0 : i32
    %c0_i32_1 = arith.constant 0 : i32
    return %arg0, %arg1, %c0_i32, %c0_i32_0 : i32, i32, i32, i32
  }
}

</mosaic_0001>

<bundles_post_ra>
// kernel: tpu_custom_call.1
= control target key start
LH: loop header
LB: loop body
LE: loop exit
PB: predicated region body
PF: predicated region fallthrough
CT: control target
= control target key end

     0   :  { %s1113_s0 = inlined_call_operand.hbm [shape: f32[4], index: 0, kind: input, shape index: {}]   ;;  %s1114_s1 = inlined_call_operand.hbm [shape: s32[2,1,256], index: 1, kind: input, shape index: {}]   ;;  %s1115_s2 = inlined_call_operand.hbm [shape: f32[2,4,256], index: 2, kind: input, shape index: {}]   ;;  %s1116_s3 = inlined_call_operand.vmem [shape: f32[2,1,1,1], index: 3, kind: output, shape index: {0}]   ;;  %s1117_s4 = inlined_call_operand.vmem [shape: f32[2,1,1,1], index: 4, kind: output, shape index: {1}]  }
   0x1   :  { %s722_s17 = scalar_lea.hbm %s1113_s0, 16 }
   0x2   :  { %p723_p0 = scmp.ne.s32.totalorder %s1113_s0, %s722_s17  ;;  %p726_p1 = scmp.lt.u32.totalorder %s722_s17, %s1113_s0 }
   0x4   :  { %p728_p2 = pnand %p726_p1, %p723_p0 }
   0x6   :  { %731 = shalt.err (!%p728_p2)  }
   0x7   :  { %s850_s22 = smov [#allocation3]  }
   0x8   :  { %11 = dma.hbm_to_smem %s1113_s0, 16, %s850_s22, [#allocation2] }
   0x9   :  { %816 = dma.done.wait [#allocation2], 16 }
   0xa   :  { %817 = vsyncadd [#allocation2], 4294967280 }
   0xb   :  { %13 = sfence }
   0xc   :  { %14 = vsyncpa [#allocation5], 0 }
   0xd   :  { %16 = vsyncpa [#allocation5 + $0x1], 0 }
   0xe   :  { %17 = vsyncpa [#allocation7], 0 }
   0xf   :  { %19 = vsyncpa [#allocation7 + $0x1], 0  ;;  %s893_s25 = smov 0   ;;  %s895_s26 = smov 0  }
  0x10   :  { %s897_s27 = smov 0   ;;  %s899_s28 = smov 0  }
  0x11   :  { %s901_s29 = smov 0   ;;  %s903_s30 = smov 0  }
  0x12 LB: > { %s631_s0 = sadd.s32 4294967295, %s848_s30   ;;  %s44_s5 = sadd.s32 1, %s844_s29  ;;  %s848_s30 = sphi %s903_s30, %s25_s30   ;;  %s844_s29 = sphi %s901_s29, %s1131_s29   ;;  %s840_s28 = sphi %s899_s28, %s1130_s28   ;;  %s836_s27 = sphi %s897_s27, %s1129_s27   ;;  %s832_s26 = sphi %s895_s26, %s1128_s26   ;;  %s828_s25 = sphi %s893_s25, %s1127_s25  }
  0x13   : > { %p46_p3 = scmp.ge.s32.totalorder %s44_s5, 2  ;;  %s55_s6 = sadd.s32 1, %s836_s27 }
  0x14   : > { %p62_p4 = scmp.ne.s32.totalorder %s836_s27, %s832_s26  ;;  %p63_p5 = scmp.eq.s32.totalorder %s848_s30, 0 }
  0x15   : > { %s1133_s5 = smov (%p46_p3, %s44_s5), 0  ;;  %p68_p7 = scmp.ne.s32.totalorder %s832_s26, %s828_s25 }
  0x16   : > { %p929_p6 = por %p63_p5, %p62_p4  ;;  %s50_s8 = ssub.s32 %s844_s29, %s1133_s5 }
  0x17   : > { %p69_p8 = scmp.eq.s32.totalorder %s631_s0, 0  ;;  %p53_p9 = scmp.eq.s32.totalorder %s50_s8, 0 }
  0x18   : > { %p662_p11 = scmp.lt.s32.totalorder %s848_s30, 2  ;;  %s945_s11 = sand.u32 1, %s836_s27  }
  0x19   : > { %p936_p10 = por %p69_p8, %p68_p7  ;;  %s649_s12 = sshll.u32 %s844_s29, 5 }
  0x1a   : > { %s942_s10 = scalar_select %p53_p9, %s836_s27, %s55_s6  }
  0x1b   : > { %s1120_s9 = scalar_select %p936_p10, 1, 0 }
  0x1c   : > { %s635_s13 = sshll.u32 %s945_s11, 1  ;;  %s952_s16 = scalar_lea.hbm %s1114_s1, %s649_s12 }
  0x1d   : > { %s182_s17 = scalar_lea.vmem [#allocation4], %s635_s13  ;;  %p956_p12 = pnand %p662_p11, %p929_p6 }
  0x1e   : > { %s193_s18 = sshll.u32 %s182_s17, 4  ;;  %s179_s20 = scalar_lea.sflag [#allocation5], %s945_s11  ;;  %s960_s18 = int_to_ptr.vmem [resolvable:$true] %s193_s18 }
  0x1f   : > { %s732_s21 = scalar_lea.hbm %s952_s16, 32  ;;  %p734_p2 = pneg %p956_p12 }
  0x20   : > { %p733_p1 = scmp.ne.s32.totalorder %s952_s16, %s732_s21  ;;  %s737_s24 = scalar_lea.hbm %s1114_s1, 64 }
  0x21   : > { %p738_p5 = scmp.lt.u32.totalorder %s952_s16, %s1114_s1  ;;  %p739_p6 = scmp.lt.u32.totalorder %s737_s24, %s732_s21 }
  0x22   : > { %p735_p3 = pnand %p734_p2, %p733_p1  ;;  %p741_p8 = scmp.lt.u32.totalorder %s732_s21, %s952_s16 }
  0x23   : > { %p740_p7 = por %p739_p6, %p738_p5 }
  0x24   : > { %p736_p4 = pneg %p735_p3 }
  0x25   : > { %p742_p9 = por %p741_p8, %p740_p7 }
  0x27   : > { %p743_p11 = pnand %p742_p9, %p736_p4 }
  0x29   : > { %746 = shalt.err (!%p743_p11)
}
  0x2a   : > { %s747_s6 = scalar_lea.vmem %s960_s18, 32  ;;  %s851_s7 = smov [#allocation4]  }
  0x2b   : > { %p748_p1 = scmp.ne.s32.totalorder %s960_s18, %s747_s6  ;;  %s752_s8 = sshll.u32 %s851_s7, 4  ;;  %s753_s8 = int_to_ptr.vmem [resolvable:$false] %s752_s8 }
  0x2c   : > { %s754_s12 = scalar_lea.vmem %s753_s8, 64  ;;  %p755_p0 = scmp.lt.s32.totalorder %s960_s18, %s753_s8 }
  0x2d   : > { %p750_p3 = pnand %p748_p1, %p734_p2  ;;  %p756_p5 = scmp.lt.s32.totalorder %s754_s12, %s747_s6 }
  0x2f   : > { %p751_p13 = pneg %p750_p3  ;;  %p757_p6 = por %p756_p5, %p755_p0 }
  0x31   : > { %p758_p7 = pnand %p757_p6, %p751_p13 }
  0x33   : > { %761 = shalt.err (!%p758_p7)
}
  0x34   : > { %658 = dma.hbm_to_vmem [thread:$0]  (!%p956_p12), %s952_s16, 32, %s960_s18, %s179_s20  }
  0x35   : > { %p1122_p4 = scmp.lt.s32.totalorder %s848_s30, 3  ;;  %p1123_p8 = scmp.ge.s32.totalorder %s848_s30, 1 }
  0x36   : > { %s638_s14 = sshll.u32 %s945_s11, 3  ;;  %s650_s15 = sshll.u32 %s844_s29, 7 }
  0x37   : > { %p994_p9 = pnand %p1123_p8, %p1122_p4  ;;  %s1003_s22 = scalar_lea.hbm %s1115_s2, %s650_s15 }
  0x38   : > { %s204_s23 = scalar_lea.vmem [#allocation6], %s638_s14  ;;  %s201_s16 = scalar_lea.sflag [#allocation7], %s945_s11 }
  0x39   : > { %s1124_s13 = scalar_select %p994_p9, 1, 0 }
  0x3a   : > { %s215_s24 = sshll.u32 %s204_s23, 4  ;;  %s762_s18 = scalar_lea.hbm %s1003_s22, 128  ;;  %s216_s24 = int_to_ptr.vmem [resolvable:$true] %s215_s24 }
  0x3b   : > { %p763_p13 = scmp.ne.s32.totalorder %s1003_s22, %s762_s18  ;;  %s767_s0 = scalar_lea.hbm %s1115_s2, 256 }
  0x3c   : > { %p768_p1 = scmp.lt.u32.totalorder %s1003_s22, %s1115_s2  ;;  %p769_p3 = scmp.lt.u32.totalorder %s767_s0, %s762_s18 }
  0x3d   : > { %p765_p0 = pnand %p763_p13, %p734_p2  ;;  %p771_p6 = scmp.lt.u32.totalorder %s762_s18, %s1003_s22 }
  0x3e   : > { %p770_p5 = por %p769_p3, %p768_p1 }
  0x3f   : > { %p766_p11 = pneg %p765_p0 }
  0x40   : > { %p772_p7 = por %p771_p6, %p770_p5 }
  0x42   : > { %p773_p4 = pnand %p772_p7, %p766_p11 }
  0x44   : > { %776 = shalt.err (!%p773_p4)
}
  0x45   : > { %s777_s11 = scalar_lea.vmem %s216_s24, 128  ;;  %s852_s8 = smov [#allocation6]  }
  0x46   : > { %p778_p8 = scmp.ne.s32.totalorder %s216_s24, %s777_s11  ;;  %s782_s12 = sshll.u32 %s852_s8, 4  ;;  %s783_s12 = int_to_ptr.vmem [resolvable:$false] %s782_s12 }
  0x47   : > { %s784_s14 = scalar_lea.vmem %s783_s12, 256  ;;  %p785_p10 = scmp.lt.s32.totalorder %s216_s24, %s783_s12 }
  0x48   : > { %p780_p13 = pnand %p778_p8, %p734_p2  ;;  %p786_p9 = scmp.lt.s32.totalorder %s784_s14, %s777_s11 }
  0x4a   : > { %p781_p0 = pneg %p780_p13  ;;  %p787_p1 = por %p786_p9, %p785_p10 }
  0x4c   : > { %p788_p3 = pnand %p787_p1, %p781_p0 }
  0x4e   : > { %791 = shalt.err (!%p788_p3)
}
  0x4f   : > { %661 = dma.hbm_to_vmem [thread:$0]  (!%p956_p12), %s1003_s22, 128, %s216_s24, %s201_s16  }
  0x50   : > { %p1125_p11 = scmp.ne.s32.totalorder %s1124_s13, 0 }
  0x51   : > { %s226_s15 = sand.u32 (!%p1125_p11), 1, %s832_s26   ;;  %p1126_p2 = scmp.ne.s32.totalorder (!%p1125_p11), %s1120_s9, 0 }
  0x52   : > { %224 = sbr.rel (%p1125_p11) target bundleno = 321 (0x141), region = 28  ;;  %s642_s17 = sshll.u32 (!%p1125_p11), %s226_s15, 1 }
  0x53   : > { %s227_s21 = scalar_lea.sflag (!%p1125_p11), [#allocation5], %s226_s15  ;;  %s1028_s23 = scalar_lea.vmem (!%p1125_p11), [#allocation4], %s642_s17 }
  0x59   : > { %819 = dma.done.wait (%p1126_p2), %s227_s21, 32  }
  0x5a   : > { %821 = vsyncadd (%p1126_p2), %s227_s21, 4294967264  ;;  %s643_s18 = sshll.u32 %s226_s15, 3  ;;  %s236_s19 = scalar_lea.sflag [#allocation7], %s226_s15 }
  0x5b   : > { %s239_s20 = scalar_lea.vmem [#allocation6], %s643_s18 }
  0x5c   : > { %823 = dma.done.wait (%p1126_p2), %s236_s19, 128  }
  0x5d   : > { %825 = vsyncadd (%p1126_p2), %s236_s19, 4294967168  ;;  %p278_p10 = scmp.lt.s32.totalorder %s840_s28, 1  ;;  %vm294_vm0 = vcmask 0   ;;  %v853_v0 = vmov 0.0   ;;  %v357_v1 = vld [vmem:[%s239_s20] sm:$0xff]  ;;  %vm361_vm1 = vcmask 1043456   ;;  %v315_v14 = vlaneseq }
  0x5e   : > { %v359_v2 = vcombine.high %v357_v1, %v357_v1  ;;  %v362_v3 = vsel %vm361_vm1, %v357_v1, -inf  ;;  %v1062_v23 = vld [vmem:[%s1028_s23] sm:$0x3]  ;;  %v854_v50 = vmov 1966171168   ;;  %s329_s9 = sld [smem:[#allocation3]] }
  0x5f   : > { %s1135_s28 = smov (!%p278_p10, %s840_s28), 1  ;;  %v363_v4 = vrot.slane %v362_v3, 4  ;;  %v316_v18 = vshrl.u32 %v315_v14, 7  ;;  %v313_v51 = vunpack.c.l.s4 %v854_v50  ;;  %s644_s16 = sld [smem:[#allocation3 + $0x1]]  ;;  %v855_v58 = vmov 1  }
  0x60   : > { %s1046_s24 = scalar_lea.vmem %s1116_s3, %s1135_s28  ;;  %v369_v5 = vsel %vm361_vm1, %v359_v2, -inf  ;;  %v311_v59 = vcombine.low %v855_v58, %v855_v58  ;;  %s645_s25 = sld [smem:[#allocation3 + $0x2]]  ;;  %vm328_vm4 = vcmp.eq.s32.totalorder %v1062_v23, 0  ;;  %vm332_vm5 = vcmp.eq.s32.totalorder %v1062_v23, 1 }
  0x61   : > { %295 = vst.msk [vmem:[%s1046_s24] sm:$0x1] %vm294_vm0, %v853_v0  ;;  %v364_v6 = vmax.f32 %v362_v3, %v363_v4  ;;  %v370_v7 = vrot.slane %v369_v5, 4  ;;  %v1059_v21 = vsub.s32 0, %v316_v18  ;;  %v1064_v24 = vsub.s32 1, %v316_v18  ;;  %s646_s0 = sld [smem:[#allocation3 + $0x3]]  ;;  %s289_s11 = scalar_lea.vmem %s1117_s4, %s1135_s28 }
  0x62   : > { %v314_v55 = vunpack.c.0.s8 %v313_v51  ;;  %vm336_vm6 = vcmp.eq.s32.totalorder %v1062_v23, 2  ;;  %vm306_vm7 = vcmp.ne.s32.totalorder %v1062_v23, 4294967196  ;;  %vm340_vm8 = vcmp.eq.s32.totalorder %v1062_v23, 3  ;;  %296 = vst.msk [vmem:[%s289_s11] sm:$0x1] %vm294_vm0, %v853_v0 }
  0x63   : > { %v365_v8 = vrot.slane %v364_v6, 2  ;;  %v371_v9 = vmax.f32 %v369_v5, %v370_v7  ;;  %v350_v25 = vrot.slane %v1062_v23, %v1059_v21  ;;  %v354_v26 = vrot.slane %v1062_v23, %v1064_v24 }
  0x64   : > { %v317_v60 = vsub.s32 %v314_v55, %v316_v18  ;;  %vm457_vm11 = vcmask 1040384  }
  0x65   : > { %v366_v10 = vmax.f32 %v364_v6, %v365_v8  ;;  %v372_v11 = vrot.slane %v371_v9, 2  ;;  %vm355_vm2 = vcmp.eq.s32.totalorder %v316_v18, %v350_v25  ;;  %vm356_vm3 = vcmp.eq.s32.totalorder %v316_v18, %v354_v26 }
  0x66   : > { %v404_v27 = vsel %vm355_vm2, %v357_v1, 0.0  ;;  %v405_v31 = vsel %vm356_vm3, %v359_v2, 0.0  ;;  %v318_v2 = vrot.slane %v311_v59, %v317_v60  ;;  %v334_v6 = vstv %s644_s16 }
  0x67   : > { %v367_v12 = vrot.slane %v366_v10, 1  ;;  %v373_v13 = vmax.f32 %v371_v9, %v372_v11  ;;  %v406_v33 = vsel %vm361_vm1, %v404_v27, 0.0  ;;  %v413_v37 = vsel %vm361_vm1, %v405_v31, 0.0 }
  0x68   : > { %v407_v38 = vrot.slane %v406_v33, 4  ;;  %v414_v41 = vrot.slane %v413_v37, 4  ;;  %v325_v11 = vrot.slane %v318_v2, %v317_v60 }
  0x69   : > { %v1053_v15 = vmax.f32 %v366_v10, %v367_v12  ;;  %v374_v16 = vrot.slane %v373_v13, 1 }
  0x6a   : > { %v408_v44 = vadd.f32 %v407_v38, %v406_v33  ;;  %v415_v47 = vadd.f32 %v414_v41, %v413_v37  ;;  %vm326_vm9 = vcmp.ne.s32.totalorder %v325_v11, 0  ;;  %v445_v38 = vld [vmem:[%s1046_s24] sm:$0x1] }
  0x6b   : > { %v1055_v17 = vmax.f32 %v373_v13, %v374_v16  ;;  %v338_v16 = vstv %s645_s25  ;;  %vm327_vm10 = vmand %vm306_vm7, %vm326_vm9 }
  0x6c   : > { %v409_v52 = vrot.slane %v408_v44, 2  ;;  %v416_v54 = vrot.slane %v415_v47, 2 }
  0x6d   : > { %v378_v19 = vcombine.low %v1053_v15, %v1055_v17 }
  0x6e   : > { %v410_v56 = vadd.f32 %v409_v52, %v408_v44  ;;  %v417_v57 = vadd.f32 %v416_v54, %v415_v47 }
  0x6f   : > { %v380_v20 = vsub.f32 %v357_v1, %v378_v19  ;;  %v330_v1 = vstv %s329_s9 }
  0x70   : > { %v411_v61 = vrot.slane %v410_v56, 1  ;;  %v418_v62 = vrot.slane %v417_v57, 1  ;;  %v331_v7 = vsel %vm328_vm4, %v330_v1, 0.0 }
  0x71   : > { %v381_v22 = vmul.f32 1.442695, %v380_v20  ;;  %v335_v14 = vsel %vm332_vm5, %v334_v6, %v331_v7  ;;  %v342_v20 = vstv %s646_s0 }
  0x72   : > { %v412_v4 = vadd.f32 %v411_v61, %v410_v56  ;;  %v419_v9 = vadd.f32 %v418_v62, %v417_v57  ;;  %v339_v19 = vsel %vm336_vm6, %v338_v16, %v335_v14 }
  0x73   : > { %716 = vpow2.f32 %v381_v22 }
  0x7d   : > { %v717_v28 = vpop.eup %716 }
  0x7e   : > { %v384_v29 = vcombine.high %v717_v28, %v717_v28  ;;  %v386_v30 = vsel %vm361_vm1, %v717_v28, 0.0 }
  0x7f   : > { %v387_v32 = vrot.slane %v386_v30, 4 }
  0x80   : > { %v393_v34 = vsel %vm361_vm1, %v384_v29, 0.0 }
  0x81   : > { %v388_v35 = vadd.f32 %v387_v32, %v386_v30  ;;  %v394_v36 = vrot.slane %v393_v34, 4 }
  0x83   : > { %v389_v39 = vrot.slane %v388_v35, 2  ;;  %v395_v40 = vadd.f32 %v394_v36, %v393_v34 }
  0x85   : > { %v390_v42 = vadd.f32 %v389_v39, %v388_v35  ;;  %v396_v43 = vrot.slane %v395_v40, 2 }
  0x87   : > { %v391_v45 = vrot.slane %v390_v42, 1  ;;  %v397_v46 = vadd.f32 %v396_v43, %v395_v40  ;;  %v466_v40 = vld [vmem:[%s289_s11] sm:$0x1] }
  0x89   : > { %v392_v48 = vadd.f32 %v391_v45, %v390_v42  ;;  %v398_v49 = vrot.slane %v397_v46, 1 }
  0x8b   : > { %v399_v53 = vadd.f32 %v398_v49, %v397_v46  ;;  %718 = vlog2.f32 %v392_v48 }
  0x8d   : > { %720 = vlog2.f32 %v399_v53 }
  0x95   : > { %v719_v63 = vpop.eup %718 }
  0x96   : > { %v401_v3 = vmul.f32 0.6931472, %v719_v63 }
  0x97   : > { %v721_v5 = vpop.eup %720 }
  0x98   : > { %v403_v8 = vmul.f32 0.6931472, %v721_v5  ;;  %v420_v10 = vadd.f32 %v401_v3, %v1053_v15  ;;  %v343_v15 = vsel %vm340_vm8, %v342_v20, %v339_v19 }
  0x99   : > { %v344_v27 = vsel %vm327_vm10, %v343_v15, 0.0 }
  0x9a   : > { %v421_v12 = vadd.f32 %v403_v8, %v1055_v17  ;;  %v422_v13 = vsub.f32 %v420_v10, %v412_v4  ;;  %v471_v28 = vrot.slane %v344_v27, %v1059_v21  ;;  %v475_v29 = vrot.slane %v344_v27, %v1064_v24 }
  0x9c   : > { %v423_v18 = vsub.f32 %v421_v12, %v419_v9  ;;  %v478_v34 = vsel %vm457_vm11, %v471_v28, 0.0  ;;  %v479_v35 = vsel %vm457_vm11, %v475_v29, 0.0 }
  0x9d   : > { %v480_v37 = vadd.f32 %v479_v35, %v478_v34 }
  0x9e   : > { %v426_v22 = vcombine.low %v422_v13, %v423_v18 }
  0xa0   : > { %v433_v25 = vrot.slane %v426_v22, %v317_v60 }
  0xa2   : > { %v440_v26 = vrot.slane %v433_v25, %v317_v60 }
  0xa4   : > { %v442_v17 = vmul.f32 %v440_v26, %v343_v15 }
  0xa6   : > { %v443_v30 = vsel %vm327_vm10, %v442_v17, 0.0 }
  0xa7   : > { %v450_v23 = vrot.slane %v443_v30, %v1059_v21  ;;  %v454_v31 = vrot.slane %v443_v30, %v1064_v24 }
  0xa9   : > { %v458_v32 = vsel %vm457_vm11, %v450_v23, 0.0  ;;  %v459_v33 = vsel %vm457_vm11, %v454_v31, 0.0 }
  0xaa   : > { %v460_v36 = vadd.f32 %v459_v33, %v458_v32 }
  0xac   : > { %461 = vadd.xlane.f32.xlu0 %v460_v36 }
  0xb0   : > { %481 = vadd.xlane.f32.xlu0 %v480_v37 }
 0x139   : > { %v462_v21 = vpop.xlane.xlu0 %461 }
 0x13a   : > { %v463_v39 = vadd.f32 %v462_v21, %v445_v38 }
 0x13c   : > { %465 = vst.msk [vmem:[%s1046_s24] sm:$0x1] %vm294_vm0, %v463_v39 }
 0x13d   : > { %v482_v24 = vpop.xlane.xlu0 %481 }
 0x13e   : > { %v483_v41 = vadd.f32 %v482_v24, %v466_v40 }
 0x140   : > { %484 = vst.msk [vmem:[%s289_s11] sm:$0x1] %vm294_vm0, %v483_v41 }
 0x141 PF: > { %s25_s30 = sadd.s32 1, %s848_s30   ;;  %s1127_s25 = smov %s832_s26 }
 0x142   : > { %p22_p12 = scmp.ge.s32.totalorder %s25_s30, 4   ;;  %s1128_s26 = smov %s836_s27 }
 0x143   : > { %s1129_s27 = smov %s942_s10  ;;  %s1130_s28 = smov %s844_s29 }
 0x144   : > { %s1131_s29 = smov %s1133_s5  ;;  %24 = sbr.rel (!%p22_p12) target bundleno = 18 (0x12), region = 97 }
 0x14b   :  { %526 = vsyncpa [#allocation5], 1 }
 0x14c   :  { %528 = vsyncpa [#allocation5 + $0x1], 1 }
 0x14d   :  { %529 = vsyncpa [#allocation7], 1 }
 0x14e   :  { %531 = vsyncpa [#allocation7 + $0x1], 1 }

</bundles_post_ra>
